<compile_context>
chip_gen: v7x
topology: tpu7x:2x2x1
jax: 0.10.0
libtpu: 0.0.40
codegen_flags: <defaults>
</compile_context>

<pallas_src>
import functools

import numpy as np
import jax
import jax.numpy as jnp
from jax.experimental import pallas as pl
from jax.experimental.pallas import tpu as pltpu

SPP_LEVELS = (1, 2, 4)
ROUTER_PROJ_CH = 8      # convs_proj out_channels in the reference module
FINAL_CONV_PAD = 4      # nn.Conv2d(..., kernel_size=1, padding=4)


# ---------------------------------------------------------------------------
# Offline weight packing: fold per-patch convs into dense patch matrices
# ---------------------------------------------------------------------------
def _conv3x3_patch_matrix(w, p):
    """w: (O, C, 3, 3).  Returns M (C*p*p, O*p*p) s.t. for a flattened patch
    x[c*p*p + y*p + x] the product x @ M equals Conv2d(k=3, padding=1) applied
    to that patch in isolation (zero padding at patch borders), flattened as
    out[o*p*p + y*p + x]."""
    w = np.asarray(w, np.float32)
    O, C = w.shape[0], w.shape[1]
    pp = p * p
    M = np.zeros((C * pp, O * pp), np.float32)
    for dy in range(3):
        for dx in range(3):
            for yo in range(p):
                yi = yo + dy - 1
                if yi < 0 or yi >= p:
                    continue
                for xo in range(p):
                    xi = xo + dx - 1
                    if xi < 0 or xi >= p:
                        continue
                    rows = np.arange(C) * pp + (yi * p + xi)
                    cols = np.arange(O) * pp + (yo * p + xo)
                    M[np.ix_(rows, cols)] = w[:, :, dy, dx].T
    return M


def _conv1x1_patch_matrix(w, p):
    """w: (O, I).  Dense (I*p*p, O*p*p) matrix applying the 1x1 conv pointwise
    on the flattened patch layout (bias handled outside)."""
    w = np.asarray(w, np.float32)
    O, I = w.shape
    pp = p * p
    M = np.zeros((I * pp, O * pp), np.float32)
    for pix in range(pp):
        rows = np.arange(I) * pp + pix
        cols = np.arange(O) * pp + pix
        M[np.ix_(rows, cols)] = w.T
    return M


# ---------------------------------------------------------------------------
# Fused per-layer Pallas kernel
# ---------------------------------------------------------------------------
def _make_layer_kernel(n_proj_cols, hard):
    """Per row-tile (rows = patches):
         acc    = a @ W1 + b1          # router-proj ++ expert conv (one bf16 dot)
         score  = sigmoid(mean(acc[:, :n_proj_cols]))          # router
         gated  = relu(acc[:, n_proj_cols:]) * score           # ConvExpert + gate
         out    = gated @ W2           # final 1x1 conv (bias added in wrapper)
    """
    def kernel(a_ref, w1_ref, b1_ref, w2_ref, thr_ref, o_ref):
        a = a_ref[...].astype(jnp.bfloat16)          # bf16 MXU path, f32 accumulate
        acc = jnp.dot(a, w1_ref[...], preferred_element_type=jnp.float32)
        acc = acc + b1_ref[...]
        proj = acc[:, :n_proj_cols]                  # (tile, 8*p*p) router projection
        expert = jnp.maximum(acc[:, n_proj_cols:], 0.0)
        score = jax.nn.sigmoid(jnp.mean(proj, axis=1, keepdims=True))   # (tile, 1)
        if hard:
            # TODO(synk): reference comparison direction (>= vs >) unknown; using '>'.
            score = (score > thr_ref[0, 0]).astype(jnp.float32)
        gated = (expert * score).astype(jnp.bfloat16)
        o_ref[...] = jnp.dot(gated, w2_ref[...], preferred_element_type=jnp.float32)
    return kernel


def _pick_patch_tile(M, max_tile=512, min_grid=4):
    """Largest row tile (multiple of 8, <= max_tile) that divides M while still
    leaving >= min_grid 'parallel' grid steps (so both v7x TensorCores get
    work).  Falls back to fewer steps / a single full block for awkward M --
    no wrapper-side padding or slicing needed."""
    if M % 8 != 0:
        return M
    fallback = None
    for d in range(min(M, max_tile), 7, -1):
        if d % 8 == 0 and M % d == 0:
            if M // d >= min_grid:
                return d
            if fallback is None:
                fallback = d
    return fallback if fallback is not None else M


def pce_layer_call(a, w1, b1, w2, thr, *, n_proj_cols, hard):
    """a: (num_patches, C*p*p) f32; w1/w2 bf16 patch matrices; b1 (1, N1) f32;
    thr (1,1) f32 scalar.  Returns (num_patches, O*p*p) f32 (final-conv output,
    bias NOT included)."""
    M, K = a.shape
    N1 = w1.shape[1]
    K2, N2 = w2.shape
    tile_p = _pick_patch_tile(M)
    # Per-step VMEM: w1 + w2 (bf16, <= ~320 KiB) + tiny row tiles, double
    # buffered -> well under the 32 MiB default scoped VMEM on every chip.
    return pl.pallas_call(
        _make_layer_kernel(n_proj_cols, hard),
        out_shape=jax.ShapeDtypeStruct((M, N2), jnp.float32),
        grid=(M // tile_p,),
        in_specs=[
            pl.BlockSpec((tile_p, K), lambda i: (i, 0)),      # patch rows (tiled)
            pl.BlockSpec((K, N1), lambda i: (0, 0)),          # proj|expert weights
            pl.BlockSpec((1, N1), lambda i: (0, 0)),          # proj|expert biases
            pl.BlockSpec((K2, N2), lambda i: (0, 0)),         # final 1x1 conv weights
            pl.BlockSpec(memory_space=pltpu.MemorySpace.SMEM),  # router threshold
        ],
        out_specs=pl.BlockSpec((tile_p, N2), lambda i: (i, 0)),
        compiler_params=pltpu.CompilerParams(
            dimension_semantics=("parallel",)),
    )(a, w1, b1, w2, thr)


# ---------------------------------------------------------------------------
# Final classifier matmul kernel
# ---------------------------------------------------------------------------
def _linear_kernel(x_ref, w_ref, b_ref, o_ref):
    x = x_ref[...].astype(jnp.bfloat16)
    o_ref[...] = jnp.dot(x, w_ref[...], preferred_element_type=jnp.float32) + b_ref[...]


def linear_call(x, w, b):
    Bn, F = x.shape
    N = w.shape[1]
    return pl.pallas_call(
        _linear_kernel,
        out_shape=jax.ShapeDtypeStruct((Bn, N), jnp.float32),
        grid=(1,),
        in_specs=[pl.BlockSpec((Bn, F), lambda i: (0, 0)),
                  pl.BlockSpec((F, N), lambda i: (0, 0)),
                  pl.BlockSpec((1, N), lambda i: (0, 0))],
        out_specs=pl.BlockSpec((Bn, N), lambda i: (0, 0)),
    )(x, w, b)


# ---------------------------------------------------------------------------
# Plain-JAX glue
# ---------------------------------------------------------------------------
def spp(x, levels=SPP_LEVELS):
    """router.ssp: average-pool spatial pyramid pooling -> (B, C * sum(L^2))."""
    B, C, H, W = x.shape
    feats = []
    for L in levels:
        xr = x.reshape(B, C, L, H // L, L, W // L).mean(axis=(3, 5))
        feats.append(xr.reshape(B, C * L * L))
    return jnp.concatenate(feats, axis=-1)


# ---------------------------------------------------------------------------
# Parameters (deterministic, PyTorch-style uniform init) + packing
# ---------------------------------------------------------------------------
def _conv_init(key, out_ch, in_ch, ksize):
    kw, kb = jax.random.split(key)
    bound = 1.0 / float(in_ch * ksize * ksize) ** 0.5
    w = jax.random.uniform(kw, (out_ch, in_ch, ksize, ksize), jnp.float32, -bound, bound)
    b = jax.random.uniform(kb, (out_ch,), jnp.float32, -bound, bound)
    return w, b


def init_pce_params(key, in_channels, layer_number, num_classes):
    convs_proj, experts, final_convs, thresholds = [], [], [], []
    c = in_channels
    out_ch = 8
    for l in range(layer_number):
        key, k1, k2, k3 = jax.random.split(key, 4)
        convs_proj.append(_conv_init(k1, ROUTER_PROJ_CH, c, 3))   # router projection conv
        experts.append(_conv_init(k2, out_ch, c, 3))              # ConvExpert conv
        final_convs.append(_conv_init(k3, out_ch, out_ch, 1))     # final 1x1 conv
        thresholds.append(jnp.float32(0.5))
        c = out_ch
        # TODO(synk): original __init__ does inpt_channel = out_channel + 4, which is
        # inconsistent with the channels the forward pass actually produces for
        # layer_number > 1; the channel schedule here follows the real data flow.
        if l % 2 == 0:
            out_ch *= 2
    spp_feat = c * sum(L * L for L in SPP_LEVELS)
    key, kl = jax.random.split(key)
    kw, kb = jax.random.split(kl)
    bound = 1.0 / float(spp_feat) ** 0.5
    lw = jax.random.uniform(kw, (spp_feat, num_classes), jnp.float32, -bound, bound)
    lb = jax.random.uniform(kb, (num_classes,), jnp.float32, -bound, bound)
    return {"convs_proj": convs_proj, "experts": experts, "final_conv": final_convs,
            "thresholds": thresholds, "linear": (lw, lb)}


def pack_pce_params(params, patch_size):
    """Fold convs into kernel-ready patch matrices (one-time, outside jit)."""
    p = patch_size
    pp = p * p
    layers = []
    for l in range(len(params["convs_proj"])):
        pw, pb = params["convs_proj"][l]
        ew, eb = params["experts"][l]
        fw, fb = params["final_conv"][l]
        w_proj = _conv3x3_patch_matrix(pw, p)                      # (C*pp, 8*pp)
        w_exp = _conv3x3_patch_matrix(ew, p)                       # (C*pp, O*pp)
        w1 = np.concatenate([w_proj, w_exp], axis=1)               # shared-A fusion
        b1 = np.concatenate([np.repeat(np.asarray(pb, np.float32), pp),
                             np.repeat(np.asarray(eb, np.float32), pp)])[None, :]
        w2 = _conv1x1_patch_matrix(np.asarray(fw)[:, :, 0, 0], p)  # (O*pp, O*pp)
        layers.append({
            "w1": jnp.asarray(w1, jnp.bfloat16),
            "b1": jnp.asarray(b1, jnp.float32),
            "w2": jnp.asarray(w2, jnp.bfloat16),
            "fb": jnp.asarray(fb, jnp.float32),
            "thr": jnp.reshape(jnp.asarray(params["thresholds"][l], jnp.float32), (1, 1)),
        })
    lw, lb = params["linear"]
    return {"layers": layers,
            "lin_w": jnp.asarray(lw, jnp.bfloat16),
            "lin_b": jnp.reshape(jnp.asarray(lb, jnp.float32), (1, -1))}


# ---------------------------------------------------------------------------
# PCENetwork forward
# ---------------------------------------------------------------------------
@functools.partial(jax.jit, static_argnames=("patch_size", "hard_threshold_router"))
def pce_forward(packed, X, patch_size=4, hard_threshold_router=False):
    p = patch_size
    pp = p * p
    n_proj = ROUTER_PROJ_CH * pp
    for layer in packed["layers"]:
        B, C, H, W = X.shape
        h, w = H // p, W // p
        # PatchExtractor: rows = patches (b, hp, wp); cols = c*pp + py*p + px.
        a = (X.reshape(B, C, h, p, w, p)
               .transpose(0, 2, 4, 1, 3, 5)
               .reshape(B * h * w, C * pp))
        out = pce_layer_call(a, layer["w1"], layer["b1"], layer["w2"], layer["thr"],
                             n_proj_cols=n_proj, hard=hard_threshold_router)
        O = out.shape[1] // pp
        # Reassemble patches: 'b (h w) c ph pw -> b c (h ph) (w pw)'.
        interior = (out.reshape(B, h, w, O, p, p)
                        .transpose(0, 3, 1, 4, 2, 5)
                        .reshape(B, O, H, W))
        # final Conv2d(k=1, padding=4): interior computed in-kernel (no bias);
        # the width-4 border of the padded output equals the bias alone.
        pad = FINAL_CONV_PAD
        X = (jnp.pad(interior, ((0, 0), (0, 0), (pad, pad), (pad, pad)))
             + layer["fb"][None, :, None, None])
    feats = spp(X)                    # router.ssp (assumed avg-pool SPP, levels 1/2/4)
    return linear_call(feats, packed["lin_w"], packed["lin_b"])   # LazyLinear, eager


if __name__ == "__main__":
    key = jax.random.PRNGKey(0)
    kx, kp = jax.random.split(key)

    B, C, H, W = 2, 4, 16, 16
    patch_size = 4
    layer_number = 2
    num_classes = 10

    X = jax.random.normal(kx, (B, C, H, W), jnp.float32)
    params = init_pce_params(kp, in_channels=C, layer_number=layer_number,
                             num_classes=num_classes)
    packed = pack_pce_params(params, patch_size)

    logits = pce_forward(packed, X, patch_size=patch_size,
                         hard_threshold_router=False)
    logits = jax.block_until_ready(logits)
    assert logits.shape == (B, num_classes), logits.shape
    assert bool(jnp.all(jnp.isfinite(logits)))
    print("KERNEL_OK")
</pallas_src>

<mosaic_0001>
module attributes {stable_mosaic.version = 11 : i64} {
  func.func @kernel(%arg0: i32, %arg1: memref<8x64xf32, #tpu.memory_space<vmem>>, %arg2: memref<64x256xbf16, #tpu.memory_space<vmem>>, %arg3: memref<1x256xf32, #tpu.memory_space<vmem>>, %arg4: memref<128x128xbf16, #tpu.memory_space<vmem>>, %arg5: memref<1x1xf32, #tpu.memory_space<smem>>, %arg6: memref<8x128xf32, #tpu.memory_space<vmem>>) attributes {dimension_semantics = [#tpu.dimension_semantics<parallel>], iteration_bounds = array<i64: 4>, scalar_prefetch = 0 : i64, scratch_operands = 0 : i64, tpu.core_type = #tpu.core_type<tc>, window_params = [{transform_indices = @transform_0, window_bounds = array<i64: 8, 64>}, {pipeline_mode = #tpu.pipeline_mode<synchronous>, transform_indices = @transform_1, window_bounds = array<i64: 64, 256>}, {pipeline_mode = #tpu.pipeline_mode<synchronous>, transform_indices = @transform_2, window_bounds = array<i64: 1, 256>}, {pipeline_mode = #tpu.pipeline_mode<synchronous>, transform_indices = @transform_3, window_bounds = array<i64: 128, 128>}, {transform_indices = @transform_4, window_bounds = array<i64: 1, 1>}, {transform_indices = @transform_5, window_bounds = array<i64: 8, 128>}]} {
    %c0 = arith.constant 0 : index
    %c0_0 = arith.constant 0 : index
    %0 = vector.load %arg1[%c0, %c0_0] : memref<8x64xf32, #tpu.memory_space<vmem>>, vector<8x64xf32>
    %1 = arith.truncf %0 : vector<8x64xf32> to vector<8x64xbf16>
    %c0_1 = arith.constant 0 : index
    %c0_2 = arith.constant 0 : index
    %2 = vector.load %arg2[%c0_1, %c0_2] : memref<64x256xbf16, #tpu.memory_space<vmem>>, vector<64x256xbf16>
    %cst = arith.constant dense<0.000000e+00> : vector<8x256xf32>
    %3 = tpu.matmul %1, %2, %cst {dimension_numbers = #tpu.dot_dimension_numbers<[1], [0], [0], [1], [0, 0, 1, 1], [], []>} : vector<8x64xbf16>, vector<64x256xbf16>, vector<8x256xf32> -> vector<8x256xf32>
    %c0_3 = arith.constant 0 : index
    %c0_4 = arith.constant 0 : index
    %4 = vector.load %arg3[%c0_3, %c0_4] : memref<1x256xf32, #tpu.memory_space<vmem>>, vector<1x256xf32>
    %5 = vector.broadcast %4 : vector<1x256xf32> to vector<8x256xf32>
    %6 = arith.addf %3, %5 : vector<8x256xf32>
    %7 = vector.extract_strided_slice %6 {offsets = [0, 0], sizes = [8, 128], strides = [1, 1]} : vector<8x256xf32> to vector<8x128xf32>
    %8 = vector.extract_strided_slice %6 {offsets = [0, 128], sizes = [8, 128], strides = [1, 1]} : vector<8x256xf32> to vector<8x128xf32>
    %cst_5 = arith.constant 0.000000e+00 : f32
    %9 = vector.broadcast %cst_5 : f32 to vector<8x128xf32>
    %10 = arith.maximumf %8, %9 : vector<8x128xf32>
    %cst_6 = arith.constant dense<0.000000e+00> : vector<8xf32>
    %11 = vector.multi_reduction <add>, %7, %cst_6 [1] : vector<8x128xf32> to vector<8xf32>
    %12 = vector.shape_cast %11 : vector<8xf32> to vector<8x1xf32>
    %cst_7 = arith.constant 1.280000e+02 : f32
    %13 = vector.broadcast %cst_7 : f32 to vector<8x1xf32>
    %14 = arith.divf %12, %13 : vector<8x1xf32>
    %15 = arith.negf %14 : vector<8x1xf32>
    %16 = math.exp %15 : vector<8x1xf32>
    %cst_8 = arith.constant 1.000000e+00 : f32
    %17 = vector.broadcast %cst_8 : f32 to vector<8x1xf32>
    %18 = arith.addf %17, %16 : vector<8x1xf32>
    %19 = arith.divf %17, %18 : vector<8x1xf32>
    %20 = vector.broadcast %19 : vector<8x1xf32> to vector<8x128xf32>
    %21 = arith.mulf %10, %20 : vector<8x128xf32>
    %22 = arith.truncf %21 : vector<8x128xf32> to vector<8x128xbf16>
    %c0_9 = arith.constant 0 : index
    %c0_10 = arith.constant 0 : index
    %23 = vector.load %arg4[%c0_9, %c0_10] : memref<128x128xbf16, #tpu.memory_space<vmem>>, vector<128x128xbf16>
    %cst_11 = arith.constant dense<0.000000e+00> : vector<8x128xf32>
    %24 = tpu.matmul %22, %23, %cst_11 {dimension_numbers = #tpu.dot_dimension_numbers<[1], [0], [0], [1], [0, 0, 1, 1], [], []>} : vector<8x128xbf16>, vector<128x128xbf16>, vector<8x128xf32> -> vector<8x128xf32>
    %c0_12 = arith.constant 0 : index
    %c0_13 = arith.constant 0 : index
    %25 = vector.load %arg6[%c0_12, %c0_13] : memref<8x128xf32, #tpu.memory_space<vmem>>, vector<8x128xf32>
    tpu.vector_store %arg6[%c0_12, %c0_13], %24 {strides = array<i32>} : memref<8x128xf32, #tpu.memory_space<vmem>>, vector<8x128xf32>,
    return
  }
  func.func @transform_0(%arg0: i32) -> (i32, i32) {
    %c0_i32 = arith.constant 0 : i32
    %c0_i32_0 = arith.constant 0 : i32
    return %arg0, %c0_i32 : i32, i32
  }
  func.func @transform_1(%arg0: i32) -> (i32, i32) {
    %c0_i32 = arith.constant 0 : i32
    %c0_i32_0 = arith.constant 0 : i32
    %c0_i32_1 = arith.constant 0 : i32
    return %c0_i32, %c0_i32_0 : i32, i32
  }
  func.func @transform_2(%arg0: i32) -> (i32, i32) {
    %c0_i32 = arith.constant 0 : i32
    %c0_i32_0 = arith.constant 0 : i32
    %c0_i32_1 = arith.constant 0 : i32
    return %c0_i32, %c0_i32_0 : i32, i32
  }
  func.func @transform_3(%arg0: i32) -> (i32, i32) {
    %c0_i32 = arith.constant 0 : i32
    %c0_i32_0 = arith.constant 0 : i32
    %c0_i32_1 = arith.constant 0 : i32
    return %c0_i32, %c0_i32_0 : i32, i32
  }
  func.func @transform_4(%arg0: i32) -> (i32, i32) {
    %c0_i32 = arith.constant 0 : i32
    %c0_i32_0 = arith.constant 0 : i32
    %c0_i32_1 = arith.constant 0 : i32
    return %c0_i32, %c0_i32_0 : i32, i32
  }
  func.func @transform_5(%arg0: i32) -> (i32, i32) {
    %c0_i32 = arith.constant 0 : i32
    %c0_i32_0 = arith.constant 0 : i32
    return %arg0, %c0_i32 : i32, i32
  }
}

module attributes {stable_mosaic.version = 11 : i64} {
  func.func @kernel(%arg0: i32, %arg1: memref<8x128xf32, #tpu.memory_space<vmem>>, %arg2: memref<128x384xbf16, #tpu.memory_space<vmem>>, %arg3: memref<1x384xf32, #tpu.memory_space<vmem>>, %arg4: memref<256x256xbf16, #tpu.memory_space<vmem>>, %arg5: memref<1x1xf32, #tpu.memory_space<smem>>, %arg6: memref<8x256xf32, #tpu.memory_space<vmem>>) attributes {dimension_semantics = [#tpu.dimension_semantics<parallel>], iteration_bounds = array<i64: 9>, scalar_prefetch = 0 : i64, scratch_operands = 0 : i64, tpu.core_type = #tpu.core_type<tc>, window_params = [{transform_indices = @transform_0, window_bounds = array<i64: 8, 128>}, {pipeline_mode = #tpu.pipeline_mode<synchronous>, transform_indices = @transform_1, window_bounds = array<i64: 128, 384>}, {pipeline_mode = #tpu.pipeline_mode<synchronous>, transform_indices = @transform_2, window_bounds = array<i64: 1, 384>}, {pipeline_mode = #tpu.pipeline_mode<synchronous>, transform_indices = @transform_3, window_bounds = array<i64: 256, 256>}, {transform_indices = @transform_4, window_bounds = array<i64: 1, 1>}, {transform_indices = @transform_5, window_bounds = array<i64: 8, 256>}]} {
    %c0 = arith.constant 0 : index
    %c0_0 = arith.constant 0 : index
    %0 = vector.load %arg1[%c0, %c0_0] : memref<8x128xf32, #tpu.memory_space<vmem>>, vector<8x128xf32>
    %1 = arith.truncf %0 : vector<8x128xf32> to vector<8x128xbf16>
    %c0_1 = arith.constant 0 : index
    %c0_2 = arith.constant 0 : index
    %2 = vector.load %arg2[%c0_1, %c0_2] : memref<128x384xbf16, #tpu.memory_space<vmem>>, vector<128x384xbf16>
    %cst = arith.constant dense<0.000000e+00> : vector<8x384xf32>
    %3 = tpu.matmul %1, %2, %cst {dimension_numbers = #tpu.dot_dimension_numbers<[1], [0], [0], [1], [0, 0, 1, 1], [], []>} : vector<8x128xbf16>, vector<128x384xbf16>, vector<8x384xf32> -> vector<8x384xf32>
    %c0_3 = arith.constant 0 : index
    %c0_4 = arith.constant 0 : index
    %4 = vector.load %arg3[%c0_3, %c0_4] : memref<1x384xf32, #tpu.memory_space<vmem>>, vector<1x384xf32>
    %5 = vector.broadcast %4 : vector<1x384xf32> to vector<8x384xf32>
    %6 = arith.addf %3, %5 : vector<8x384xf32>
    %7 = vector.extract_strided_slice %6 {offsets = [0, 0], sizes = [8, 128], strides = [1, 1]} : vector<8x384xf32> to vector<8x128xf32>
    %8 = vector.extract_strided_slice %6 {offsets = [0, 128], sizes = [8, 256], strides = [1, 1]} : vector<8x384xf32> to vector<8x256xf32>
    %cst_5 = arith.constant 0.000000e+00 : f32
    %9 = vector.broadcast %cst_5 : f32 to vector<8x256xf32>
    %10 = arith.maximumf %8, %9 : vector<8x256xf32>
    %cst_6 = arith.constant dense<0.000000e+00> : vector<8xf32>
    %11 = vector.multi_reduction <add>, %7, %cst_6 [1] : vector<8x128xf32> to vector<8xf32>
    %12 = vector.shape_cast %11 : vector<8xf32> to vector<8x1xf32>
    %cst_7 = arith.constant 1.280000e+02 : f32
    %13 = vector.broadcast %cst_7 : f32 to vector<8x1xf32>
    %14 = arith.divf %12, %13 : vector<8x1xf32>
    %15 = arith.negf %14 : vector<8x1xf32>
    %16 = math.exp %15 : vector<8x1xf32>
    %cst_8 = arith.constant 1.000000e+00 : f32
    %17 = vector.broadcast %cst_8 : f32 to vector<8x1xf32>
    %18 = arith.addf %17, %16 : vector<8x1xf32>
    %19 = arith.divf %17, %18 : vector<8x1xf32>
    %20 = vector.broadcast %19 : vector<8x1xf32> to vector<8x256xf32>
    %21 = arith.mulf %10, %20 : vector<8x256xf32>
    %22 = arith.truncf %21 : vector<8x256xf32> to vector<8x256xbf16>
    %c0_9 = arith.constant 0 : index
    %c0_10 = arith.constant 0 : index
    %23 = vector.load %arg4[%c0_9, %c0_10] : memref<256x256xbf16, #tpu.memory_space<vmem>>, vector<256x256xbf16>
    %cst_11 = arith.constant dense<0.000000e+00> : vector<8x256xf32>
    %24 = tpu.matmul %22, %23, %cst_11 {dimension_numbers = #tpu.dot_dimension_numbers<[1], [0], [0], [1], [0, 0, 1, 1], [], []>} : vector<8x256xbf16>, vector<256x256xbf16>, vector<8x256xf32> -> vector<8x256xf32>
    %c0_12 = arith.constant 0 : index
    %c0_13 = arith.constant 0 : index
    %25 = vector.load %arg6[%c0_12, %c0_13] : memref<8x256xf32, #tpu.memory_space<vmem>>, vector<8x256xf32>
    tpu.vector_store %arg6[%c0_12, %c0_13], %24 {strides = array<i32>} : memref<8x256xf32, #tpu.memory_space<vmem>>, vector<8x256xf32>,
    return
  }
  func.func @transform_0(%arg0: i32) -> (i32, i32) {
    %c0_i32 = arith.constant 0 : i32
    %c0_i32_0 = arith.constant 0 : i32
    return %arg0, %c0_i32 : i32, i32
  }
  func.func @transform_1(%arg0: i32) -> (i32, i32) {
    %c0_i32 = arith.constant 0 : i32
    %c0_i32_0 = arith.constant 0 : i32
    %c0_i32_1 = arith.constant 0 : i32
    return %c0_i32, %c0_i32_0 : i32, i32
  }
  func.func @transform_2(%arg0: i32) -> (i32, i32) {
    %c0_i32 = arith.constant 0 : i32
    %c0_i32_0 = arith.constant 0 : i32
    %c0_i32_1 = arith.constant 0 : i32
    return %c0_i32, %c0_i32_0 : i32, i32
  }
  func.func @transform_3(%arg0: i32) -> (i32, i32) {
    %c0_i32 = arith.constant 0 : i32
    %c0_i32_0 = arith.constant 0 : i32
    %c0_i32_1 = arith.constant 0 : i32
    return %c0_i32, %c0_i32_0 : i32, i32
  }
  func.func @transform_4(%arg0: i32) -> (i32, i32) {
    %c0_i32 = arith.constant 0 : i32
    %c0_i32_0 = arith.constant 0 : i32
    %c0_i32_1 = arith.constant 0 : i32
    return %c0_i32, %c0_i32_0 : i32, i32
  }
  func.func @transform_5(%arg0: i32) -> (i32, i32) {
    %c0_i32 = arith.constant 0 : i32
    %c0_i32_0 = arith.constant 0 : i32
    return %arg0, %c0_i32 : i32, i32
  }
}

module attributes {stable_mosaic.version = 11 : i64} {
  func.func @_linear_kernel(%arg0: i32, %arg1: memref<2x336xf32, #tpu.memory_space<vmem>>, %arg2: memref<336x10xbf16, #tpu.memory_space<vmem>>, %arg3: memref<1x10xf32, #tpu.memory_space<vmem>>, %arg4: memref<2x10xf32, #tpu.memory_space<vmem>>) attributes {dimension_semantics = [#tpu.dimension_semantics<arbitrary>], iteration_bounds = array<i64: 1>, scalar_prefetch = 0 : i64, scratch_operands = 0 : i64, tpu.core_type = #tpu.core_type<tc>, window_params = [{pipeline_mode = #tpu.pipeline_mode<synchronous>, transform_indices = @transform_0, window_bounds = array<i64: 2, 336>}, {pipeline_mode = #tpu.pipeline_mode<synchronous>, transform_indices = @transform_1, window_bounds = array<i64: 336, 10>}, {pipeline_mode = #tpu.pipeline_mode<synchronous>, transform_indices = @transform_2, window_bounds = array<i64: 1, 10>}, {pipeline_mode = #tpu.pipeline_mode<synchronous>, transform_indices = @transform_3, window_bounds = array<i64: 2, 10>}]} {
    %c0 = arith.constant 0 : index
    %c0_0 = arith.constant 0 : index
    %0 = vector.load %arg1[%c0, %c0_0] : memref<2x336xf32, #tpu.memory_space<vmem>>, vector<2x336xf32>
    %1 = arith.truncf %0 : vector<2x336xf32> to vector<2x336xbf16>
    %c0_1 = arith.constant 0 : index
    %c0_2 = arith.constant 0 : index
    %2 = vector.load %arg2[%c0_1, %c0_2] : memref<336x10xbf16, #tpu.memory_space<vmem>>, vector<336x10xbf16>
    %cst = arith.constant dense<0.000000e+00> : vector<2x10xf32>
    %3 = tpu.matmul %1, %2, %cst {dimension_numbers = #tpu.dot_dimension_numbers<[1], [0], [0], [1], [0, 0, 1, 1], [], []>} : vector<2x336xbf16>, vector<336x10xbf16>, vector<2x10xf32> -> vector<2x10xf32>
    %c0_3 = arith.constant 0 : index
    %c0_4 = arith.constant 0 : index
    %4 = vector.load %arg3[%c0_3, %c0_4] : memref<1x10xf32, #tpu.memory_space<vmem>>, vector<1x10xf32>
    %5 = vector.broadcast %4 : vector<1x10xf32> to vector<2x10xf32>
    %6 = arith.addf %3, %5 : vector<2x10xf32>
    %c0_5 = arith.constant 0 : index
    %c0_6 = arith.constant 0 : index
    %7 = vector.load %arg4[%c0_5, %c0_6] : memref<2x10xf32, #tpu.memory_space<vmem>>, vector<2x10xf32>
    tpu.vector_store %arg4[%c0_5, %c0_6], %6 {strides = array<i32>} : memref<2x10xf32, #tpu.memory_space<vmem>>, vector<2x10xf32>,
    return
  }
  func.func @transform_0(%arg0: i32) -> (i32, i32) {
    %c0_i32 = arith.constant 0 : i32
    %c0_i32_0 = arith.constant 0 : i32
    %c0_i32_1 = arith.constant 0 : i32
    return %c0_i32, %c0_i32_0 : i32, i32
  }
  func.func @transform_1(%arg0: i32) -> (i32, i32) {
    %c0_i32 = arith.constant 0 : i32
    %c0_i32_0 = arith.constant 0 : i32
    %c0_i32_1 = arith.constant 0 : i32
    return %c0_i32, %c0_i32_0 : i32, i32
  }
  func.func @transform_2(%arg0: i32) -> (i32, i32) {
    %c0_i32 = arith.constant 0 : i32
    %c0_i32_0 = arith.constant 0 : i32
    %c0_i32_1 = arith.constant 0 : i32
    return %c0_i32, %c0_i32_0 : i32, i32
  }
  func.func @transform_3(%arg0: i32) -> (i32, i32) {
    %c0_i32 = arith.constant 0 : i32
    %c0_i32_0 = arith.constant 0 : i32
    %c0_i32_1 = arith.constant 0 : i32
    return %c0_i32, %c0_i32_0 : i32, i32
  }
}

</mosaic_0001>

<bundles_post_ra>
// kernel: pce_forward.3
= control target key start
LH: loop header
LB: loop body
LE: loop exit
PB: predicated region body
PF: predicated region fallthrough
CT: control target
= control target key end

     0   :  { %11 = vsyncpa [#allocation4], 0  ;;  %s970_s0 = inlined_call_operand.vmem [shape: f32[32,64], index: 0, kind: input, shape index: {}]   ;;  %s971_s1 = inlined_call_operand.hbm [shape: bf16[64,256], index: 1, kind: input, shape index: {}]   ;;  %s972_s2 = inlined_call_operand.hbm [shape: f32[1,256], index: 2, kind: input, shape index: {}]   ;;  %s973_s3 = inlined_call_operand.hbm [shape: bf16[128,128], index: 3, kind: input, shape index: {}]   ;;  %s974_s4 = inlined_call_operand.<no memory space> [shape: f32[1,1], index: 4, kind: input, shape index: {}]   ;;  %s975_s5 = inlined_call_operand.vmem [shape: f32[32,128], index: 5, kind: output, shape index: {}]  }
   0x1   :  { %12 = vsyncpa [#allocation6], 0  ;;  %s845_s18 = smov 0  }
   0x2 LB: > { %s805_s19 = smov [#allocation5]   ;;  %s851_s21 = sadd.s32 4294967295, %s803_s18   ;;  %s803_s18 = sphi %s845_s18, %s18_s18  }
   0x3   : > { %s185_s20 = sshll.u32 %s805_s19, 4  ;;  %p575_p0 = scmp.ge.s32.totalorder %s803_s18, 1  ;;  %s186_s20 = int_to_ptr.vmem [resolvable:$true] %s185_s20 }
   0x4   : > { %p159_p1 = scmp.lt.s32.totalorder %s803_s18, 5  ;;  %p976_p2 = scmp.eq.s32.totalorder %s851_s21, 0 }
   0x5   : > { %s806_s22 = smov [#allocation3]   ;;  %s807_s25 = smov [#allocation7]  }
   0x6   : > { %p856_p3 = pnand %p575_p0, %p159_p1  ;;  %s171_s23 = sshll.u32 %s806_s22, 4  ;;  %s862_s23 = int_to_ptr.vmem [resolvable:$true] %s171_s23 }
   0x7   : > { %s195_s26 = sshll.u32 %s807_s25, 4  ;;  %s705_s29 = scalar_lea.hbm %s972_s2, 32  ;;  %s870_s26 = int_to_ptr.vmem [resolvable:$true] %s195_s26 }
   0x8   : > { %s978_s4 = scalar_select %p856_p3, 1, 0 }
   0x9   : > { %p647_p4 = pneg %p856_p3  ;;  %p706_p6 = scmp.ne.s32.totalorder %s972_s2, %s705_s29 }
   0xa   : > { %p712_p10 = scmp.lt.u32.totalorder %s705_s29, %s972_s2 }
   0xb   : > { %p866_p5 = pnand %p976_p2, %p647_p4 }
   0xd   : > { %p880_p7 = pneg %p866_p5 }
   0xf   : > { %p708_p8 = pnand %p880_p7, %p706_p6 }
  0x11   : > { %p709_p9 = pneg %p708_p8 }
  0x13   : > { %p714_p11 = pnand %p712_p10, %p709_p9 }
  0x15   : > { %717 = shalt.err (!%p714_p11)
}
  0x16   : > { %s718_s10 = scalar_lea.vmem %s186_s20, 32  ;;  %p726_p1 = scmp.lt.s32.totalorder %s186_s20, %s186_s20 }
  0x17   : > { %p719_p12 = scmp.ne.s32.totalorder %s186_s20, %s718_s10  ;;  %p727_p4 = scmp.lt.s32.totalorder %s718_s10, %s718_s10 }
  0x19   : > { %p721_p13 = pnand %p719_p12, %p880_p7  ;;  %p728_p2 = por %p727_p4, %p726_p1 }
  0x1b   : > { %p722_p0 = pneg %p721_p13 }
  0x1d   : > { %p729_p3 = pnand %p728_p2, %p722_p0 }
  0x1f   : > { %732 = shalt.err (!%p729_p3)
}
  0x20   : > { %653 = dma.hbm_to_vmem [thread:$0]  (!%p866_p5), %s972_s2, 32, %s186_s20, [#allocation6]  }
  0x21   : > { %s733_s15 = scalar_lea.hbm %s971_s1, 1024 }
  0x22   : > { %p734_p6 = scmp.ne.s32.totalorder %s971_s1, %s733_s15  ;;  %p740_p2 = scmp.lt.u32.totalorder %s733_s15, %s971_s1 }
  0x24   : > { %p736_p8 = pnand %p734_p6, %p880_p7 }
  0x26   : > { %p737_p9 = pneg %p736_p8 }
  0x28   : > { %p742_p3 = pnand %p740_p2, %p737_p9 }
  0x2a   : > { %745 = shalt.err (!%p742_p3)
}
  0x2b   : > { %s746_s20 = scalar_lea.vmem %s862_s23, 1024  ;;  %p754_p13 = scmp.lt.s32.totalorder %s862_s23, %s862_s23 }
  0x2c   : > { %p747_p10 = scmp.ne.s32.totalorder %s862_s23, %s746_s20  ;;  %p755_p0 = scmp.lt.s32.totalorder %s746_s20, %s746_s20 }
  0x2e   : > { %p749_p11 = pnand %p747_p10, %p880_p7  ;;  %p756_p1 = por %p755_p0, %p754_p13 }
  0x30   : > { %p750_p12 = pneg %p749_p11 }
  0x32   : > { %p757_p4 = pnand %p756_p1, %p750_p12 }
  0x34   : > { %760 = shalt.err (!%p757_p4)
}
  0x35   : > { %s808_s25 = smov 128   ;;  %s809_s27 = smov 8  }
  0x36   : > { %650 = dma.hbm_to_vmem [thread:$0]  (!%p866_p5), %s971_s1, 1024, %s862_s23, [#allocation4], %s808_s25, %s808_s25, %s809_s27  }
  0x37   : > { %s761_s8 = scalar_lea.hbm %s973_s3, 1024 }
  0x38   : > { %p762_p6 = scmp.ne.s32.totalorder %s973_s3, %s761_s8  ;;  %p768_p2 = scmp.lt.u32.totalorder %s761_s8, %s973_s3 }
  0x3a   : > { %p764_p8 = pnand %p762_p6, %p880_p7 }
  0x3c   : > { %p765_p9 = pneg %p764_p8 }
  0x3e   : > { %p770_p3 = pnand %p768_p2, %p765_p9 }
  0x40   : > { %773 = shalt.err (!%p770_p3)
}
  0x41   : > { %s774_s23 = scalar_lea.vmem %s870_s26, 1024  ;;  %p782_p13 = scmp.lt.s32.totalorder %s870_s26, %s870_s26 }
  0x42   : > { %p775_p10 = scmp.ne.s32.totalorder %s870_s26, %s774_s23  ;;  %p783_p0 = scmp.lt.s32.totalorder %s774_s23, %s774_s23 }
  0x44   : > { %p777_p11 = pnand %p775_p10, %p880_p7  ;;  %p784_p1 = por %p783_p0, %p782_p13 }
  0x46   : > { %p778_p12 = pneg %p777_p11 }
  0x48   : > { %p785_p4 = pnand %p784_p1, %p778_p12 }
  0x4a   : > { %788 = shalt.err (!%p785_p4)
}
  0x4b   : > { %s810_s13 = smov 64   ;;  %s811_s14 = smov 4  }
  0x4c   : > { %656 = dma.hbm_to_vmem [thread:$0]  (!%p866_p5), %s973_s3, 1024, %s870_s26, [#allocation6], %s810_s13, %s810_s13, %s811_s14  }
  0x4d   : > { %p981_p6 = scmp.ne.s32.totalorder %s978_s4, 0 }
  0x4e   : > { %p982_p7 = scmp.eq.s32.totalorder (!%p981_p6), %s851_s21, 0 }
  0x4f   : > { %221 = sbr.rel (%p981_p6) target bundleno = 710 (0x2c6), region = 40 }
  0x56   : > { %794 = dma.done.wait (%p982_p7), [#allocation4], 1024   ;;  %p983_p8 = pmov %p982_p7 }
  0x57   : > { %p984_p9 = pmov %p982_p7 }
  0x58   : > { %796 = vsyncadd (%p983_p8), [#allocation4], 4294966272 }
  0x59   : > { %798 = dma.done.wait (%p984_p9), [#allocation6], 1056   ;;  %p985_p2 = pmov %p982_p7 }
  0x5a   : > { %v812_v0 = vmov 0   ;;  %p255_p5 = scmp.lt.s32.totalorder %s851_s21, 3  ;;  %v681_v1 = vld [vmem:[#allocation3 + $0x4] ss:$8 sps:$4 sm:$0xff]   ;;  %v683_v2 = vld [vmem:[#allocation3] ss:$8 sps:$4 sm:$0xff]   ;;  %v276_v11 = vlaneseq }
  0x5b   : > { %800 = vsyncadd (%p985_p2), [#allocation6], 4294966240  ;;  %362 = vmatprep.mubr.bf16.mxu0 %v812_v0  ;;  %330 = vmatprep.subr.bf16.mxu0 %v681_v1  ;;  %v684_v3 = vld [vmem:[#allocation3 + $0x14] ss:$8 sps:$4 sm:$0xff]   ;;  %v686_v4 = vld [vmem:[#allocation3 + $0x10] ss:$8 sps:$4 sm:$0xff]  }
  0x5c   : > { %s987_s21 = smov (!%p255_p5, %s851_s21), 3  ;;  %331 = vmatpush1.bf16.msra.mxu0 %v683_v2  ;;  %v687_v5 = vld [vmem:[#allocation3 + $0x24] ss:$8 sps:$4 sm:$0xff]   ;;  %v689_v6 = vld [vmem:[#allocation3 + $0x20] ss:$8 sps:$4 sm:$0xff]   ;;  %vm326_vm0 = vcmask 523264  }
  0x5d   : > { %332 = vmatprep.subr.bf16.mxu0 %v684_v3  ;;  %s584_s4 = sshll.u32 %s987_s21, 3  ;;  %v690_v7 = vld [vmem:[#allocation3 + $0x34] ss:$8 sps:$4 sm:$0xff]   ;;  %v692_v8 = vld [vmem:[#allocation3 + $0x30] ss:$8 sps:$4 sm:$0xff]   ;;  %v277_v12 = vshrl.u32 %v276_v11, 7 }
  0x5e   : > { %s258_s7 = scalar_lea.vmem %s970_s0, %s584_s4  ;;  %v274_v13 = vld [vmem:[#allocation5] sm:$0x3]  ;;  %v693_v24 = vld [vmem:[#allocation7] sm:$0xff]   ;;  %v813_v25 = vmov 0.0   ;;  %v694_v26 = vld [vmem:[#allocation7 + $0x8] sm:$0xff]   ;;  %vm814_vm1 = vmmov 0   ;;  %s262_s22 = scalar_lea.vmem %s975_s5, %s584_s4 }
  0x5f   : > { %v264_v9 = vld [vmem:[%s258_s7] sm:$0xff]  ;;  %v282_v14 = vsub.s32 1, %v277_v12  ;;  %v278_v16 = vsub.s32 0, %v277_v12  ;;  %615 = vmatprep.subr.bf16.mxu1 %v813_v25  ;;  %v695_v27 = vld [vmem:[#allocation7 + $0x10] sm:$0xff]   ;;  %v698_v30 = vld [vmem:[#allocation7 + $0x28] sm:$0xff]   ;;  %631 = vmatprep.mubr.msk.bf16.mxu1 %vm814_vm1, %v813_v25 }
  0x60   : > { %333 = vmatpush1.bf16.msra.mxu0 %v686_v4  ;;  %v265_v10 = vpack.c.bf16 %v264_v9, %v264_v9  ;;  %616 = vmatpush3.bf16.msra.mxu1 %v693_v24  ;;  %v696_v28 = vld [vmem:[#allocation7 + $0x18] sm:$0xff]   ;;  %v697_v29 = vld [vmem:[#allocation7 + $0x20] sm:$0xff]   ;;  %v699_v31 = vld [vmem:[#allocation7 + $0x30] sm:$0xff]  }
  0x61   : > { %334 = vmatprep.subr.bf16.mxu0 %v687_v5  ;;  %v283_v15 = vrot.slane %v274_v13, %v282_v14  ;;  %v279_v17 = vrot.slane %v274_v13, %v278_v16  ;;  %617 = vmatprep.subr.bf16.mxu1 %v813_v25  ;;  %v700_v32 = vld [vmem:[#allocation7 + $0x38] sm:$0xff]  }
  0x64   : > { %335 = vmatpush1.bf16.msra.mxu0 %v689_v6  ;;  %618 = vmatpush3.bf16.msra.mxu1 %v694_v26 }
  0x65   : > { %336 = vmatprep.subr.bf16.mxu0 %v690_v7  ;;  %619 = vmatprep.subr.bf16.mxu1 %v813_v25 }
  0x68   : > { %337 = vmatpush1.bf16.msra.mxu0 %v692_v8  ;;  %620 = vmatpush3.bf16.msra.mxu1 %v695_v27 }
  0x69   : > { %621 = vmatprep.subr.bf16.mxu1 %v813_v25 }
  0x6b   : > { %594 = vmatmul.mubr.msk.bf16.vlgmr.msra.gmra.mrb[0].mxu0 %vm326_vm0, %v265_v10 }
  0x6c   : > { %622 = vmatpush3.bf16.msra.mxu1 %v696_v28 }
  0x6d   : > { %623 = vmatprep.subr.bf16.mxu1 %v813_v25 }
  0x70   : > { %624 = vmatpush3.bf16.msra.mxu1 %v697_v29 }
  0x71   : > { %625 = vmatprep.subr.bf16.mxu1 %v813_v25 }
  0x74   : > { %626 = vmatpush3.bf16.msra.mxu1 %v698_v30 }
  0x75   : > { %627 = vmatprep.subr.bf16.mxu1 %v813_v25 }
  0x78   : > { %628 = vmatpush3.bf16.msra.mxu1 %v699_v31 }
  0x79   : > { %629 = vmatprep.subr.bf16.mxu1 %v813_v25 }
  0x7c   : > { %630 = vmatpush3.bf16.msra.mxu1 %v700_v32 }
 0x13e   : > { %v364_v18 = vpop.f32.mrb[0].mxu0 }
 0x13f   : > { %v366_v19 = vpop.f32.mrb[1].mxu0  ;;  %v365_v20 = vadd.f32 %v364_v18, %v279_v17 }
 0x140   : > { %v367_v21 = vadd.f32 %v366_v19, %v283_v15  ;;  %v368_v22 = vpop.f32.mrb[2].mxu0 }
 0x141   : > { %v369_v23 = vpop.f32.mrb[3].mxu0  ;;  %372 = vadd.xlane.f32.xlu0 %v365_v20 }
 0x142   : > { %v371_v38 = vmax.f32 %v367_v21, 0.0 }
 0x1ce   : > { %v373_v33 = vpop.xlane.xlu0 %372 }
 0x1cf   : > { %v595_v34 = vmul.f32 -0.0078125, %v373_v33 }
 0x1d1   : > { %v377_v35 = vmul.f32 1.442695, %v595_v34 }
 0x1d3   : > { %701 = vpow2.f32 %v377_v35 }
 0x1dd   : > { %v702_v36 = vpop.eup %701 }
 0x1de   : > { %v379_v37 = vadd.f32 1.0, %v702_v36 }
 0x1e0   : > { %703 = vrcp.f32 %v379_v37 }
 0x1ea   : > { %v704_v39 = vpop.eup %703 }
 0x1eb   : > { %v382_v40 = vmul.f32 %v704_v39, %v371_v38 }
 0x1ed   : > { %v383_v41 = vpack.c.bf16 %v382_v40, %v382_v40 }
 0x1ef   : > { %632 = vmatmul.mubr.bf16.vlgmr.msra.gmra.mrb[0].mxu1 %v383_v41 }
 0x2c2   : > { %v482_v42 = vpop.f32.mrb[0].mxu1 }
 0x2c3   : > { %488 = vst [vmem:[%s262_s22] sm:$0xff] %v482_v42  ;;  %v633_v43 = vpop.f32.mrb[1].mxu1 }
 0x2c4   : > { %v485_v44 = vpop.f32.mrb[2].mxu1 }
 0x2c5   : > { %v634_v45 = vpop.f32.mrb[3].mxu1 }
 0x2c6 PF: > { %s18_s18 = sadd.s32 1, %s803_s18  }
 0x2c7   : > { %p15_p3 = scmp.ge.s32.totalorder %s18_s18, 6  }
 0x2c9   :  { %17 = sbr.rel (!%p15_p3) target bundleno = 2 (0x2), region = 83 }
 0x2d0   :  { %508 = vsyncpa [#allocation4], 1 }
 0x2d1   :  { %510 = vsyncpa [#allocation4 + $0x1], 1 }
 0x2d2   :  { %511 = vsyncpa [#allocation6], 1 }

// kernel: pce_forward.4
= control target key start
LH: loop header
LB: loop body
LE: loop exit
PB: predicated region body
PF: predicated region fallthrough
CT: control target
= control target key end

     0   :  { %s1023_s18 = smov 0   ;;  %s1215_s0 = inlined_call_operand.vmem [shape: f32[72,128], index: 0, kind: input, shape index: {}]   ;;  %s1216_s1 = inlined_call_operand.vmem [shape: bf16[128,384], index: 1, kind: input, shape index: {}]   ;;  %s1217_s2 = inlined_call_operand.vmem [shape: f32[1,384], index: 2, kind: input, shape index: {}]   ;;  %s1218_s3 = inlined_call_operand.vmem [shape: bf16[256,256], index: 3, kind: input, shape index: {}]   ;;  %s1219_s4 = inlined_call_operand.<no memory space> [shape: f32[1,1], index: 4, kind: input, shape index: {}]   ;;  %s1220_s5 = inlined_call_operand.vmem [shape: f32[72,256], index: 5, kind: output, shape index: {}]  }
   0x1 LB: > { %s790_s19 = sadd.s32 4294967295, %s988_s18   ;;  %p794_p0 = scmp.ge.s32.totalorder %s988_s18, 1  ;;  %s988_s18 = sphi %s1023_s18, %s16_s18  }
   0x2   : > { %p187_p1 = scmp.lt.s32.totalorder %s988_s18, 10 }
   0x4   : > { %p188_p2 = pnand %p794_p0, %p187_p1 }
   0x5   : > { %v898_v0 = vld [vmem:[%s1216_s1 + $0x4] ss:$12 sps:$4 sm:$0xff] (!%p188_p2)   ;;  %v900_v1 = vld [vmem:[%s1216_s1] ss:$12 sps:$4 sm:$0xff] (!%p188_p2)   ;;  %v990_v2 = vmov (!%p188_p2), 0   ;;  %p214_p3 = scmp.lt.s32.totalorder (!%p188_p2), %s790_s19, 8  ;;  %v260_v44 = vlaneseq (!%p188_p2) }
   0x6   : > { %191 = sbr.rel (%p188_p2) target bundleno = 642 (0x282), region = 40  ;;  %435 = vmatprep.mubr.bf16.mxu1 (!%p188_p2), %v990_v2  ;;  %403 = vmatprep.subr.bf16.mxu1 (!%p188_p2), %v898_v0  ;;  %v901_v3 = vld [vmem:[%s1216_s1 + $0x1c] ss:$12 sps:$4 sm:$0xff] (!%p188_p2)   ;;  %v903_v4 = vld [vmem:[%s1216_s1 + $0x18] ss:$12 sps:$4 sm:$0xff] (!%p188_p2)   ;;  %v991_v20 = vmov (!%p188_p2), 0.0  }
   0x7   : > { %404 = vmatpush1.bf16.msra.mxu1 (!%p188_p2), %v900_v1  ;;  %v904_v5 = vld [vmem:[%s1216_s1 + $0x34] ss:$12 sps:$4 sm:$0xff] (!%p188_p2)   ;;  %v906_v6 = vld [vmem:[%s1216_s1 + $0x30] ss:$12 sps:$4 sm:$0xff] (!%p188_p2)   ;;  %v907_v7 = vld [vmem:[%s1216_s1 + $0x4c] ss:$12 sps:$4 sm:$0xff] (!%p188_p2)  }
   0x8   : > { %405 = vmatprep.subr.bf16.mxu1 (!%p188_p2), %v901_v3  ;;  %v909_v8 = vld [vmem:[%s1216_s1 + $0x48] ss:$12 sps:$4 sm:$0xff] (!%p188_p2)   ;;  %v910_v9 = vld [vmem:[%s1216_s1 + $0x64] ss:$12 sps:$4 sm:$0xff] (!%p188_p2)   ;;  %v912_v10 = vld [vmem:[%s1216_s1 + $0x60] ss:$12 sps:$4 sm:$0xff] (!%p188_p2)  }
   0x9   : > { %v913_v11 = vld [vmem:[%s1216_s1 + $0x7c] ss:$12 sps:$4 sm:$0xff] (!%p188_p2)   ;;  %v915_v12 = vld [vmem:[%s1216_s1 + $0x78] ss:$12 sps:$4 sm:$0xff] (!%p188_p2)   ;;  %v916_v13 = vld [vmem:[%s1216_s1 + $0x94] ss:$12 sps:$4 sm:$0xff] (!%p188_p2)  }
   0xa   : > { %v918_v14 = vld [vmem:[%s1216_s1 + $0x90] ss:$12 sps:$4 sm:$0xff] (!%p188_p2)   ;;  %v919_v15 = vld [vmem:[%s1216_s1 + $0xac] ss:$12 sps:$4 sm:$0xff] (!%p188_p2)   ;;  %v921_v16 = vld [vmem:[%s1216_s1 + $0xa8] ss:$12 sps:$4 sm:$0xff] (!%p188_p2)  }
   0xb   : > { %406 = vmatpush1.bf16.msra.mxu1 (!%p188_p2), %v903_v4  ;;  %v922_v19 = vld [vmem:[%s1216_s1 + $0x8] ss:$12 sps:$4 sm:$0xff] (!%p188_p2)   ;;  %v923_v21 = vld [vmem:[%s1216_s1 + $0x20] ss:$12 sps:$4 sm:$0xff] (!%p188_p2)   ;;  %vm992_vm0 = vmmov (!%p188_p2), 0   ;;  %v261_v45 = vshrl.u32 (!%p188_p2), %v260_v44, 7 }
   0xc   : > { %407 = vmatprep.subr.bf16.mxu1 (!%p188_p2), %v904_v5  ;;  %v924_v22 = vld [vmem:[%s1216_s1 + $0x38] ss:$12 sps:$4 sm:$0xff] (!%p188_p2)   ;;  %v925_v23 = vld [vmem:[%s1216_s1 + $0x50] ss:$12 sps:$4 sm:$0xff] (!%p188_p2)   ;;  %v926_v24 = vld [vmem:[%s1216_s1 + $0x68] ss:$12 sps:$4 sm:$0xff] (!%p188_p2)  }
   0xd   : > { %s1222_s19 = smov (!%p214_p3, %s790_s19), 8  ;;  %v927_v25 = vld [vmem:[%s1216_s1 + $0x80] ss:$12 sps:$4 sm:$0xff]   ;;  %v928_v26 = vld [vmem:[%s1216_s1 + $0x98] ss:$12 sps:$4 sm:$0xff]   ;;  %v262_v46 = vsub.s32 0, %v261_v45 }
   0xe   : > { %s795_s21 = sshll.u32 %s1222_s19, 3  ;;  %v929_v27 = vld [vmem:[%s1216_s1 + $0xb0] ss:$12 sps:$4 sm:$0xff]   ;;  %v930_v28 = vld [vmem:[%s1218_s3 + $0x4] ss:$8 sps:$4 sm:$0xff]   ;;  %s857_s16 = sshll.u32 %s1222_s19, 4 }
   0xf   : > { %408 = vmatpush1.bf16.msra.mxu1 %v906_v6  ;;  %s217_s28 = scalar_lea.vmem %s1215_s0, %s795_s21  ;;  %v932_v29 = vld [vmem:[%s1218_s3] ss:$8 sps:$4 sm:$0xff]   ;;  %v933_v30 = vld [vmem:[%s1218_s3 + $0x14] ss:$8 sps:$4 sm:$0xff]   ;;  %692 = vmatprep.subr.bf16.mxu0 %v930_v28  ;;  %v935_v31 = vld [vmem:[%s1218_s3 + $0x10] ss:$8 sps:$4 sm:$0xff]   ;;  %s222_s4 = scalar_lea.vmem %s1220_s5, %s857_s16 }
  0x10   : > { %409 = vmatprep.subr.bf16.mxu1 %v907_v7  ;;  %v224_v17 = vld [vmem:[%s217_s28] sm:$0xff]  ;;  %693 = vmatpush1.bf16.msra.mxu0 %v932_v29  ;;  %v939_v34 = vld [vmem:[%s1218_s3 + $0x34] ss:$8 sps:$4 sm:$0xff]   ;;  %v941_v35 = vld [vmem:[%s1218_s3 + $0x30] ss:$8 sps:$4 sm:$0xff]  }
  0x11   : > { %v225_v18 = vpack.c.bf16 %v224_v17, %v224_v17  ;;  %694 = vmatprep.subr.bf16.mxu0 %v933_v30  ;;  %v936_v32 = vld [vmem:[%s1218_s3 + $0x24] ss:$8 sps:$4 sm:$0xff]   ;;  %v938_v33 = vld [vmem:[%s1218_s3 + $0x20] ss:$8 sps:$4 sm:$0xff]   ;;  %v945_v38 = vld [vmem:[%s1218_s3 + $0x54] ss:$8 sps:$4 sm:$0xff]  }
  0x12   : > { %v942_v36 = vld [vmem:[%s1218_s3 + $0x44] ss:$8 sps:$4 sm:$0xff]   ;;  %v944_v37 = vld [vmem:[%s1218_s3 + $0x40] ss:$8 sps:$4 sm:$0xff]   ;;  %v947_v39 = vld [vmem:[%s1218_s3 + $0x50] ss:$8 sps:$4 sm:$0xff]  }
  0x13   : > { %410 = vmatpush1.bf16.msra.mxu1 %v909_v8  ;;  %v948_v40 = vld [vmem:[%s1218_s3 + $0x64] ss:$8 sps:$4 sm:$0xff]   ;;  %v950_v41 = vld [vmem:[%s1218_s3 + $0x60] ss:$8 sps:$4 sm:$0xff]   ;;  %v951_v42 = vld [vmem:[%s1218_s3 + $0x74] ss:$8 sps:$4 sm:$0xff]  }
  0x14   : > { %411 = vmatprep.subr.bf16.mxu1 %v910_v9  ;;  %695 = vmatpush1.bf16.msra.mxu0 %v935_v31  ;;  %v953_v43 = vld [vmem:[%s1218_s3 + $0x70] ss:$8 sps:$4 sm:$0xff]   ;;  %v258_v47 = vld [vmem:[%s1217_s2] sm:$0x7]  ;;  %v954_v54 = vld [vmem:[%s1218_s3 + $0x84] ss:$8 sps:$4 sm:$0xff]  }
  0x15   : > { %696 = vmatprep.subr.bf16.mxu0 %v936_v32  ;;  %v263_v48 = vrot.slane %v258_v47, %v262_v46  ;;  %v956_v55 = vld [vmem:[%s1218_s3 + $0x80] ss:$8 sps:$4 sm:$0xff]   ;;  %v957_v56 = vld [vmem:[%s1218_s3 + $0x94] ss:$8 sps:$4 sm:$0xff]   ;;  %v959_v57 = vld [vmem:[%s1218_s3 + $0x90] ss:$8 sps:$4 sm:$0xff]  }
  0x16   : > { %v960_v58 = vld [vmem:[%s1218_s3 + $0xa4] ss:$8 sps:$4 sm:$0xff]   ;;  %v962_v59 = vld [vmem:[%s1218_s3 + $0xa0] ss:$8 sps:$4 sm:$0xff]   ;;  %v963_v60 = vld [vmem:[%s1218_s3 + $0xb4] ss:$8 sps:$4 sm:$0xff]  }
  0x17   : > { %412 = vmatpush1.bf16.msra.mxu1 %v912_v10  ;;  %v965_v61 = vld [vmem:[%s1218_s3 + $0xb0] ss:$8 sps:$4 sm:$0xff]   ;;  %v966_v62 = vld [vmem:[%s1218_s3 + $0xc4] ss:$8 sps:$4 sm:$0xff]   ;;  %v968_v63 = vld [vmem:[%s1218_s3 + $0xc0] ss:$8 sps:$4 sm:$0xff]  }
  0x18   : > { %413 = vmatprep.subr.bf16.mxu1 %v913_v11  ;;  %697 = vmatpush1.bf16.msra.mxu0 %v938_v33  ;;  %v969_v1 = vld [vmem:[%s1218_s3 + $0xd4] ss:$8 sps:$4 sm:$0xff]   ;;  %v971_v3 = vld [vmem:[%s1218_s3 + $0xd0] ss:$8 sps:$4 sm:$0xff]   ;;  %v972_v5 = vld [vmem:[%s1218_s3 + $0xe4] ss:$8 sps:$4 sm:$0xff]  }
  0x19   : > { %698 = vmatprep.subr.bf16.mxu0 %v939_v34  ;;  %v974_v7 = vld [vmem:[%s1218_s3 + $0xe0] ss:$8 sps:$4 sm:$0xff]   ;;  %v975_v8 = vld [vmem:[%s1218_s3 + $0xf4] ss:$8 sps:$4 sm:$0xff]   ;;  %v977_v9 = vld [vmem:[%s1218_s3 + $0xf0] ss:$8 sps:$4 sm:$0xff]  }
  0x1b   : > { %414 = vmatpush1.bf16.msra.mxu1 %v915_v12 }
  0x1c   : > { %415 = vmatprep.subr.bf16.mxu1 %v916_v13  ;;  %699 = vmatpush1.bf16.msra.mxu0 %v941_v35  ;;  %v270_v13 = vsub.s32 2, %v261_v45 }
  0x1d   : > { %700 = vmatprep.subr.bf16.mxu0 %v942_v36 }
  0x1e   : > { %v271_v17 = vrot.slane %v258_v47, %v270_v13 }
  0x1f   : > { %416 = vmatpush1.bf16.msra.mxu1 %v918_v14 }
  0x20   : > { %417 = vmatprep.subr.bf16.mxu1 %v919_v15  ;;  %701 = vmatpush1.bf16.msra.mxu0 %v944_v37  ;;  %v266_v15 = vsub.s32 1, %v261_v45 }
  0x21   : > { %702 = vmatprep.subr.bf16.mxu0 %v945_v38 }
  0x23   : > { %418 = vmatpush1.bf16.msra.mxu1 %v921_v16 }
  0x24   : > { %867 = vmatprep.subr.bf16.mxu1 %v991_v20  ;;  %703 = vmatpush1.bf16.msra.mxu0 %v947_v39 }
  0x25   : > { %704 = vmatprep.subr.bf16.mxu0 %v948_v40 }
  0x26   : > { %436 = vmatmul.mubr.bf16.vlgmr.msra.gmra.mrb[0].mxu1 %v225_v18 }
  0x27   : > { %868 = vmatpush3.bf16.msra.mxu1 %v922_v19  ;;  %883 = vmatprep.mubr.msk.bf16.mxu1 %vm992_vm0, %v991_v20 }
  0x28   : > { %869 = vmatprep.subr.bf16.mxu1 %v991_v20  ;;  %705 = vmatpush1.bf16.msra.mxu0 %v950_v41 }
  0x29   : > { %706 = vmatprep.subr.bf16.mxu0 %v951_v42 }
  0x2b   : > { %870 = vmatpush3.bf16.msra.mxu1 %v923_v21 }
  0x2c   : > { %871 = vmatprep.subr.bf16.mxu1 %v991_v20  ;;  %707 = vmatpush1.bf16.msra.mxu0 %v953_v43 }
  0x2d   : > { %708 = vmatprep.subr.bf16.mxu0 %v954_v54 }
  0x2f   : > { %872 = vmatpush3.bf16.msra.mxu1 %v924_v22 }
  0x30   : > { %873 = vmatprep.subr.bf16.mxu1 %v991_v20  ;;  %709 = vmatpush1.bf16.msra.mxu0 %v956_v55 }
  0x31   : > { %710 = vmatprep.subr.bf16.mxu0 %v957_v56 }
  0x33   : > { %874 = vmatpush3.bf16.msra.mxu1 %v925_v23 }
  0x34   : > { %875 = vmatprep.subr.bf16.mxu1 %v991_v20  ;;  %711 = vmatpush1.bf16.msra.mxu0 %v959_v57 }
  0x35   : > { %712 = vmatprep.subr.bf16.mxu0 %v960_v58 }
  0x37   : > { %876 = vmatpush3.bf16.msra.mxu1 %v926_v24 }
  0x38   : > { %877 = vmatprep.subr.bf16.mxu1 %v991_v20  ;;  %713 = vmatpush1.bf16.msra.mxu0 %v962_v59 }
  0x39   : > { %714 = vmatprep.subr.bf16.mxu0 %v963_v60 }
  0x3b   : > { %878 = vmatpush3.bf16.msra.mxu1 %v927_v25 }
  0x3c   : > { %879 = vmatprep.subr.bf16.mxu1 %v991_v20  ;;  %715 = vmatpush1.bf16.msra.mxu0 %v965_v61 }
  0x3d   : > { %716 = vmatprep.subr.bf16.mxu0 %v966_v62 }
  0x3f   : > { %880 = vmatpush3.bf16.msra.mxu1 %v928_v26 }
  0x40   : > { %881 = vmatprep.subr.bf16.mxu1 %v991_v20  ;;  %717 = vmatpush1.bf16.msra.mxu0 %v968_v63 }
  0x41   : > { %718 = vmatprep.subr.bf16.mxu0 %v969_v1 }
  0x43   : > { %882 = vmatpush3.bf16.msra.mxu1 %v929_v27 }
  0x44   : > { %719 = vmatpush1.bf16.msra.mxu0 %v971_v3 }
  0x45   : > { %720 = vmatprep.subr.bf16.mxu0 %v972_v5 }
  0x46   : > { %884 = vmatmul.mubr.bf16.vlgmr.msra.gmra.mrb[4].mxu1 %v225_v18  ;;  %v267_v18 = vrot.slane %v258_v47, %v266_v15 }
  0x48   : > { %721 = vmatpush1.bf16.msra.mxu0 %v974_v7 }
  0x49   : > { %722 = vmatprep.subr.bf16.mxu0 %v975_v8 }
  0x4c   : > { %723 = vmatpush1.bf16.msra.mxu0 %v977_v9 }
  0xf9   : > { %v437_v49 = vpop.f32.mrb[0].mxu1 }
  0xfa   : > { %v439_v50 = vpop.f32.mrb[1].mxu1  ;;  %v438_v51 = vadd.f32 %v437_v49, %v263_v48 }
  0xfb   : > { %v441_v52 = vpop.f32.mrb[2].mxu1  ;;  %v440_v20 = vadd.f32 %v439_v50, %v267_v18 }
  0xfc   : > { %v442_v53 = vpop.f32.mrb[3].mxu1  ;;  %486 = vadd.xlane.f32.xlu0 %v438_v51 }
  0xfd   : > { %v484_v22 = vmax.f32 %v440_v20, 0.0 }
 0x119   : > { %v478_v0 = vpop.f32.mrb[4].mxu1 }
 0x11a   : > { %v885_v2 = vpop.f32.mrb[5].mxu1  ;;  %v479_v19 = vadd.f32 %v478_v0, %v271_v17 }
 0x11b   : > { %v481_v4 = vpop.f32.mrb[6].mxu1 }
 0x11c   : > { %v886_v6 = vpop.f32.mrb[7].mxu1  ;;  %v485_v21 = vmax.f32 %v479_v19, 0.0 }
 0x189   : > { %v487_v10 = vpop.xlane.xlu0 %486 }
 0x18a   : > { %v822_v11 = vmul.f32 -0.0078125, %v487_v10 }
 0x18c   : > { %v491_v12 = vmul.f32 1.442695, %v822_v11 }
 0x18e   : > { %978 = vpow2.f32 %v491_v12 }
 0x198   : > { %v979_v14 = vpop.eup %978 }
 0x199   : > { %v493_v16 = vadd.f32 1.0, %v979_v14 }
 0x19b   : > { %980 = vrcp.f32 %v493_v16 }
 0x1a5   : > { %v981_v23 = vpop.eup %980 }
 0x1a6   : > { %v497_v24 = vmul.f32 %v981_v23, %v485_v21  ;;  %v496_v25 = vmul.f32 %v981_v23, %v484_v22 }
 0x1a8   : > { %v499_v26 = vpack.c.bf16 %v497_v24, %v497_v24  ;;  %v498_v27 = vpack.c.bf16 %v496_v25, %v496_v25 }
 0x1aa   : > { %724 = vmatprep.mubr.bf16.mxu0 %v499_v26 }
 0x1ab   : > { %725 = vmatmul.mubr.bf16.vlgmr.msra.gmra.mrb[0].mxu0 %v498_v27 }
 0x27e   : > { %v726_v28 = vpop.f32.mrb[0].mxu0 }
 0x27f   : > { %733 = vst [vmem:[%s222_s4] sm:$0xff] %v726_v28  ;;  %v728_v29 = vpop.f32.mrb[1].mxu0 }
 0x280   : > { %734 = vst [vmem:[%s222_s4 + $0x8] sm:$0xff] %v728_v29  ;;  %v730_v30 = vpop.f32.mrb[2].mxu0 }
 0x281   : > { %v731_v31 = vpop.f32.mrb[3].mxu0 }
 0x282 PF: > { %s16_s18 = sadd.s32 1, %s988_s18  }
 0x283   : > { %p13_p4 = scmp.ge.s32.totalorder %s16_s18, 11  }
 0x285   :  { %15 = sbr.rel (!%p13_p4) target bundleno = 1 (0x1), region = 70 }

// kernel: pce_forward.5
= control target key start
LH: loop header
LB: loop body
LE: loop exit
PB: predicated region body
PF: predicated region fallthrough
CT: control target
= control target key end

     0   :  { %v430_v2 = vmov 0.0   ;;  %vm431_vm0 = vmmov 0   ;;  %v22_v15 = vlaneseq  ;;  %v432_v19 = vmov 1983009808   ;;  %s535_s0 = inlined_call_operand.vmem [shape: f32[2,336], index: 0, kind: input, shape index: {}]   ;;  %s536_s1 = inlined_call_operand.vmem [shape: bf16[336,10], index: 1, kind: input, shape index: {}]   ;;  %s537_s2 = inlined_call_operand.vmem [shape: f32[1,10], index: 2, kind: input, shape index: {}]   ;;  %s538_s3 = inlined_call_operand.hbm [shape: f32[2,10], index: 3, kind: output, shape index: {}]  }
   0x1   :  { %v384_v0 = vld [vmem:[%s536_s1 + $0x40] sm:$0xff]   ;;  %366 = vmatprep.subr.bf16.mxu1 %v430_v2  ;;  %v386_v3 = vld [vmem:[%s536_s1 + $0x48] sm:$0xff]   ;;  %376 = vmatprep.mubr.msk.bf16.mxu1 %vm431_vm0, %v430_v2  ;;  %v388_v5 = vld [vmem:[%s536_s1 + $0x50] sm:$0xff]   ;;  %v20_v20 = vunpack.c.l.s4 %v432_v19 }
   0x2   :  { %v385_v1 = vld [vmem:[%s536_s1] sm:$0xff]   ;;  %338 = vmatprep.subr.bf16.mxu0 %v384_v0  ;;  %v387_v4 = vld [vmem:[%s536_s1 + $0x8] sm:$0xff]   ;;  %v389_v6 = vld [vmem:[%s536_s1 + $0x10] sm:$0xff]   ;;  %v23_v21 = vshrl.u32 %v22_v15, 7 }
   0x3   :  { %339 = vmatpush3.bf16.msra.mxu0 %v385_v1  ;;  %v390_v7 = vld [vmem:[%s536_s1 + $0x58] sm:$0xff]   ;;  %v392_v8 = vld [vmem:[%s536_s1 + $0x80] sm:$0xff]   ;;  %v395_v10 = vld [vmem:[%s536_s1 + $0x88] sm:$0xff]  }
   0x4   :  { %340 = vmatprep.subr.bf16.mxu0 %v386_v3  ;;  %v391_v9 = vld [vmem:[%s536_s1 + $0x18] sm:$0xff]   ;;  %367 = vmatpush3.bf16.msra.mxu1 %v392_v8  ;;  %v393_v11 = vld [vmem:[%s536_s1 + $0x60] sm:$0xff]   ;;  %v398_v12 = vld [vmem:[%s536_s1 + $0x90] sm:$0xff]  }
   0x5   :  { %368 = vmatprep.subr.bf16.mxu1 %v430_v2  ;;  %v394_v13 = vld [vmem:[%s536_s1 + $0x20] sm:$0xff]   ;;  %v396_v14 = vld [vmem:[%s536_s1 + $0x68] sm:$0xff]   ;;  %v401_v16 = vld [vmem:[%s536_s1 + $0x98] sm:$0xff]  }
   0x6   :  { %v397_v17 = vld [vmem:[%s536_s1 + $0x28] sm:$0xff]   ;;  %v399_v18 = vld [vmem:[%s536_s1 + $0x70] sm:$0xff]  }
   0x7   :  { %341 = vmatpush3.bf16.msra.mxu0 %v387_v4 }
   0x8   :  { %342 = vmatprep.subr.bf16.mxu0 %v388_v5  ;;  %369 = vmatpush3.bf16.msra.mxu1 %v395_v10 }
   0x9   :  { %370 = vmatprep.subr.bf16.mxu1 %v430_v2 }
   0xb   :  { %343 = vmatpush3.bf16.msra.mxu0 %v389_v6 }
   0xc   :  { %344 = vmatprep.subr.bf16.mxu0 %v390_v7  ;;  %371 = vmatpush3.bf16.msra.mxu1 %v398_v12 }
   0xd   :  { %372 = vmatprep.subr.bf16.mxu1 %v430_v2 }
   0xf   :  { %345 = vmatpush3.bf16.msra.mxu0 %v391_v9 }
  0x10   :  { %346 = vmatprep.subr.bf16.mxu0 %v393_v11 }
  0x13   :  { %347 = vmatpush3.bf16.msra.mxu0 %v394_v13 }
  0x14   :  { %348 = vmatprep.subr.bf16.mxu0 %v396_v14 }
  0x15   :  { %8 = vsyncpa [#allocation3], 0  ;;  %373 = vmatpush3.bf16.msra.mxu1 %v401_v16  ;;  %v16_v22 = vld [vmem:[%s535_s0] sm:$0x3f]  ;;  %v400_v24 = vld [vmem:[%s536_s1 + $0x30] sm:$0xff]   ;;  %v21_v26 = vunpack.c.0.s8 %v20_v20  ;;  %vm215_vm1 = vcmask 654336  }
  0x16   :  { %v405_v23 = vld [vmem:[%s536_s1 + $0xa0] sm:$0xff]   ;;  %374 = vmatprep.subr.bf16.mxu1 %v430_v2  ;;  %v18_v25 = vcombine.high %v16_v22, %v16_v22  ;;  %v402_v27 = vld [vmem:[%s536_s1 + $0x78] sm:$0xff]   ;;  %s433_s29 = smov [#allocation2]   ;;  %vm299_vm2 = vcmask 74752  }
  0x17   :  { %349 = vmatpush3.bf16.msra.mxu0 %v397_v17  ;;  %v24_v28 = vsub.s32 %v21_v26, %v23_v21  ;;  %v403_v29 = vld [vmem:[%s536_s1 + $0x38] sm:$0xff]   ;;  %v315_v42 = vld [vmem:[%s537_s2] ss:$0 sm:$0xff]  ;;  %s307_s30 = sshll.u32 %s433_s29, 4  ;;  %s308_s30 = int_to_ptr.vmem [resolvable:$true] %s307_s30 }
  0x18   :  { %350 = vmatprep.subr.bf16.mxu0 %v399_v18  ;;  %s406_s4 = scalar_lea.vmem %s308_s30, 32  ;;  %p411_p1 = scmp.lt.s32.totalorder %s308_s30, %s308_s30 }
  0x19   :  { %375 = vmatpush3.bf16.msra.mxu1 %v405_v23  ;;  %v25_v30 = vrot.slane %v16_v22, %v24_v28  ;;  %v32_v31 = vrot.slane %v18_v25, %v24_v28  ;;  %p407_p0 = scmp.ne.s32.totalorder %s308_s30, %s406_s4  ;;  %p412_p2 = scmp.lt.s32.totalorder %s406_s4, %s406_s4 }
  0x1b   :  { %351 = vmatpush3.bf16.msra.mxu0 %v400_v24  ;;  %v33_v32 = vcombine.high %v25_v30, %v25_v30  ;;  %v39_v33 = vpack.c.bf16 %v32_v31, %v32_v31  ;;  %v37_v34 = vpack.c.bf16 %v25_v30, %v25_v30  ;;  %p413_p3 = por %p412_p2, %p411_p1 }
  0x1c   :  { %352 = vmatprep.subr.bf16.mxu0 %v402_v27 }
  0x1d   :  { %v38_v35 = vpack.c.bf16 %v33_v32, %v33_v32  ;;  %377 = vmatmul.mubr.msk.bf16.vlgmr.msra.gmra.mrb[0].mxu1 %vm215_vm1, %v39_v33  ;;  %p414_p4 = pnand %p413_p3, %p407_p0 }
  0x1f   :  { %353 = vmatpush3.bf16.msra.mxu0 %v403_v29  ;;  %251 = vmatprep.mubr.bf16.mxu0 %v38_v35 }
  0x22   :  { %252 = vmatmul.mubr.bf16.vlgmr.msra.gmra.mrb[0].mxu0 %v37_v34 }
  0xf0   :  { %v293_v36 = vpop.f32.mrb[0].mxu1 }
  0xf1   :  { %v378_v37 = vpop.f32.mrb[1].mxu1 }
  0xf2   :  { %v296_v38 = vpop.f32.mrb[2].mxu1 }
  0xf3   :  { %v379_v40 = vpop.f32.mrb[3].mxu1 }
  0xf5   :  { %v354_v39 = vpop.f32.mrb[0].mxu0 }
  0xf6   :  { %v355_v41 = vpop.f32.mrb[1].mxu0 }
  0xf7   :  { %v356_v43 = vadd.f32 %v355_v41, %v354_v39  ;;  %v357_v44 = vpop.f32.mrb[2].mxu0 }
  0xf8   :  { %v358_v45 = vpop.f32.mrb[3].mxu0 }
  0xf9   :  { %v254_v46 = vadd.f32 %v356_v43, %v315_v42 }
  0xfb   :  { %v294_v47 = vadd.f32 %v293_v36, %v254_v46 }
  0xfd   :  { %300 = vst.msk [vmem:[#allocation2] sm:$0x3] %vm299_vm2, %v294_v47 }
  0xfe   :  { %417 = shalt.err (!%p414_p4)
}
  0xff   :  { %s418_s2 = scalar_lea.hbm %s538_s3, 32 }
 0x100   :  { %p419_p5 = scmp.ne.s32.totalorder %s538_s3, %s418_s2  ;;  %p422_p6 = scmp.lt.u32.totalorder %s418_s2, %s538_s3 }
 0x102   :  { %p424_p7 = pnand %p422_p6, %p419_p5 }
 0x104   :  { %427 = shalt.err (!%p424_p7)
}
 0x105   :  { %310 = dma.vmem_to_hbm [thread:$0]  %s308_s30, 32, %s538_s3, [#allocation3]  }
 0x106   :  { %428 = dma.done.wait [#allocation3], 32  }
 0x107   :  { %429 = vsyncadd [#allocation3], 4294967264 }
 0x108   :  { %314 = vsyncpa [#allocation3], 1 }

</bundles_post_ra>
